<compile_context>
chip_gen: v6e
topology: v6e:2x2x1
jax: 0.10.0
libtpu: 0.0.40
codegen_flags: <defaults>
</compile_context>

<pallas_src>
import functools

import jax
import jax.numpy as jnp
from jax.experimental import pallas as pl
from jax.experimental.pallas import tpu as pltpu

_LANE = 128            # lane width for padding hidden / label axes
_BIAS_PAD_ROWS = 8     # bias row padded to one sublane tile inside packed buffers
_SINGLE_STEP_MAX = 256 # below this batch, a single grid step is strictly better
_NEG_BIG = -3.0e38     # finite "-inf" for masking padded label lanes


def _round_up(x, m):
    return ((x + m - 1) // m) * m


def _concat_model_kernel(x_ref, p1_ref, p2_ref, pred_ref, prob_ref, *, num_labels):
    """Fused forward:  h = relu(x @ W1' + b1');  logits = h @ W2 + b2;
    outputs argmax(logits) and logits[:, 1]  (weights pre-folded/packed host-side).

    p1_ref rows: [0:K]  = folded layer-1 weight (W_img@w1_top ; W_emr@w1_bot), lane-padded
                 [K]    = folded bias b1'
    p2_ref rows: [0:Hp] = w2 (rows lane-padded to Hp, cols padded to 128)
                 [Hp]   = b2
    """
    k = x_ref.shape[1]
    h_pad = p1_ref.shape[1]

    w1 = p1_ref[0:k, :]
    b1 = p1_ref[k:k + 1, :]
    w2 = p2_ref[0:h_pad, :]
    b2 = p2_ref[h_pad:h_pad + 1, :]

    # Layer 1 (single accumulated MXU dot; replaces 2 projections + concat + fc1).
    hidden = (
        jnp.dot(x_ref[...], w1, preferred_element_type=jnp.float32)
        + b1.astype(jnp.float32)
    )
    hidden = jnp.maximum(hidden, 0.0)  # ReLU / bias kept in f32 (v5e-safe)

    # Layer 2 — cast only the dot operand (bf16 mode), accumulate in f32.
    logits = (
        jnp.dot(hidden.astype(w2.dtype), w2, preferred_element_type=jnp.float32)
        + b2.astype(jnp.float32)
    )

    bt, c_pad = logits.shape
    col = jax.lax.broadcasted_iota(jnp.int32, (bt, c_pad), 1)
    masked = jnp.where(col < num_labels, logits, _NEG_BIG)

    # First-max argmax (torch-style tie-break), decomposed into max/min lane
    # reductions (XLU) — avoids relying on a native argmax lowering.
    row_max = jnp.max(masked, axis=-1, keepdims=True)
    idx_f = jnp.where(masked == row_max, col.astype(jnp.float32), float(c_pad))
    pred = jnp.min(idx_f, axis=-1, keepdims=True)

    pred_ref[...] = pred.astype(jnp.int32)
    # TODO(synk): prob_logits[:, 1] assumes num_labels >= 2, same as the PyTorch reference.
    prob_ref[...] = logits[:, 1:2].astype(prob_ref.dtype)


def fold_params(params, *, compute_dtype=jnp.bfloat16):
    """Host-side, one-time weight folding + packing.

    Folds the (purely linear up to the ReLU) modality projections into fc1 and
    packs everything into two contiguous, lane-dense buffers:
      p1: (d_img + d_emr + 8, H_pad)   rows = [W_img@w1_top ; W_emr@w1_bot | b1' | 0]
      p2: (H_pad + 8, C_pad)           rows = [w2 (padded)               | b2  | 0]
    Returns (folded_param_dict, num_labels).
    """
    w_img, b_img = params["w_img"], params["b_img"]
    w_emr, b_emr = params["w_emr"], params["b_emr"]
    w1, b1 = params["w1"], params["b1"]
    w2, b2 = params["w2"], params["b2"]

    d_img, fdim = w_img.shape
    d_emr = w_emr.shape[0]
    hdim = w2.shape[0]
    num_labels = w2.shape[1]
    k = d_img + d_emr

    h_pad = max(_LANE, _round_up(hdim, _LANE))
    c_pad = max(_LANE, _round_up(num_labels, _LANE))

    w1_top, w1_bot = w1[:fdim], w1[fdim:]
    w_packed = jnp.concatenate([w_img @ w1_top, w_emr @ w1_bot], axis=0)  # (K, H)
    b1f = b1 + b_img @ w1_top + b_emr @ w1_bot                            # (1, H)

    p1 = jnp.zeros((k + _BIAS_PAD_ROWS, h_pad), jnp.float32)
    p1 = p1.at[:k, :hdim].set(w_packed)
    p1 = p1.at[k, :hdim].set(b1f[0])

    p2 = jnp.zeros((h_pad + _BIAS_PAD_ROWS, c_pad), jnp.float32)
    p2 = p2.at[:hdim, :num_labels].set(w2)
    p2 = p2.at[h_pad, :num_labels].set(b2[0])

    folded = {"p1": p1.astype(compute_dtype), "p2": p2.astype(compute_dtype)}
    return folded, num_labels


def _pick_batch_tile(batch, batch_tile):
    """Single step at small B; for large B cap the tile so the parallel grid has
    >=2 steps (both v7x TCs get work) while keeping tiles big (overhead amort.)."""
    if batch <= _SINGLE_STEP_MAX:
        return batch
    half = _round_up(pl.cdiv(batch, 2), 8)
    return max(8, min(_round_up(batch_tile, 8), half))


def concat_model_forward(tensors, emrs, kgs, folded, *, num_labels, batch_tile=1024):
    """Concatmodel forward (no labels branch): returns (pred_labels, prob_logits[:, 1]).

    `kgs` is accepted for signature parity but unused (same as the PyTorch forward).
    """
    del kgs  # unused by the reference forward
    batch = tensors.shape[0]
    p1, p2 = folded["p1"], folded["p2"]

    # Host-side input pack: one (B, d_img+d_emr) slab, cast to the compute dtype
    # (bf16 halves activation DMA bytes; f32 for exact-parity mode).
    x = jnp.concatenate([tensors, emrs], axis=-1).astype(p1.dtype)
    k = x.shape[1]

    bt = _pick_batch_tile(batch, batch_tile)
    grid = (pl.cdiv(batch, bt),)

    kernel = functools.partial(_concat_model_kernel, num_labels=num_labels)

    pred, prob1 = pl.pallas_call(
        kernel,
        out_shape=(
            jax.ShapeDtypeStruct((batch, 1), jnp.int32),
            jax.ShapeDtypeStruct((batch, 1), jnp.float32),
        ),
        grid_spec=pltpu.PrefetchScalarGridSpec(
            num_scalar_prefetch=0,
            grid=grid,
            in_specs=[
                pl.BlockSpec((bt, k), lambda i: (i, 0)),
                pl.BlockSpec(p1.shape, lambda i: (0, 0)),   # packed weights, VMEM-resident
                pl.BlockSpec(p2.shape, lambda i: (0, 0)),
            ],
            out_specs=[
                pl.BlockSpec((bt, 1), lambda i: (i, 0)),
                pl.BlockSpec((bt, 1), lambda i: (i, 0)),
            ],
        ),
        compiler_params=pltpu.CompilerParams(
            dimension_semantics=("parallel",),
        ),
    )(x, p1, p2)

    return pred[:, 0], prob1[:, 0]


def init_params(key, img_dim, emr_dim, fusion_dim, out_hidden, num_labels):
    """Deterministic synthetic parameter init (PyTorch Linear shapes, stored (in, out))."""
    ks = jax.random.split(key, 8)
    middle = 2 * fusion_dim  # fused feature size == config.middle_hidden_dimension

    def lin(kw, kb, fan_in, fan_out):
        bound = 1.0 / jnp.sqrt(fan_in)
        w = jax.random.uniform(kw, (fan_in, fan_out), jnp.float32, -bound, bound)
        b = jax.random.uniform(kb, (1, fan_out), jnp.float32, -bound, bound)
        return w, b

    w_img, b_img = lin(ks[0], ks[1], img_dim, fusion_dim)
    w_emr, b_emr = lin(ks[2], ks[3], emr_dim, fusion_dim)
    w1, b1 = lin(ks[4], ks[5], middle, out_hidden)
    w2, b2 = lin(ks[6], ks[7], out_hidden, num_labels)
    return dict(
        w_img=w_img, b_img=b_img,
        w_emr=w_emr, b_emr=b_emr,
        w1=w1, b1=b1, w2=w2, b2=b2,
    )


def _reference_forward(tensors, emrs, params):
    """Pure-JAX reference of the ORIGINAL (unfolded) module math."""
    ai = tensors @ params["w_img"] + params["b_img"]
    ae = emrs @ params["w_emr"] + params["b_emr"]
    fused = jnp.concatenate([ai, ae], axis=-1)
    h = jnp.maximum(fused @ params["w1"] + params["b1"], 0.0)
    logits = h @ params["w2"] + params["b2"]
    return jnp.argmax(logits, axis=1), logits[:, 1]


if __name__ == "__main__":
    # Small, forward-consistent config:
    #   img_dimension=32, emr_dimension=16, fusion_hidden_dimension=32,
    #   middle_hidden_dimension=64 (= 2*fusion), output_hidden_dimension=32,
    #   num_labels=4, batch=8.
    B, IMG_D, EMR_D, FUSE_D, OUT_H, NUM_LABELS = 8, 32, 16, 32, 32, 4

    key = jax.random.PRNGKey(0)
    k_in, k_params = jax.random.split(key)
    k_img, k_emr, k_kg = jax.random.split(k_in, 3)

    tensors = jax.random.normal(k_img, (B, IMG_D), jnp.float32)
    emrs = jax.random.normal(k_emr, (B, EMR_D), jnp.float32)
    kgs = jax.random.normal(k_kg, (B, EMR_D), jnp.float32)  # unused, parity only

    params = init_params(k_params, IMG_D, EMR_D, FUSE_D, OUT_H, NUM_LABELS)
    ref_pred, ref_prob1 = _reference_forward(tensors, emrs, params)

    # --- f32 path: exact-parity check against the original (unfolded) math. ---
    folded32, num_labels = fold_params(params, compute_dtype=jnp.float32)
    fwd32 = jax.jit(functools.partial(concat_model_forward, num_labels=num_labels))
    pred_labels, prob1 = fwd32(tensors, emrs, kgs, folded32)
    jax.block_until_ready((pred_labels, prob1))

    assert pred_labels.shape == (B,) and prob1.shape == (B,)
    assert jnp.array_equal(pred_labels, ref_pred.astype(pred_labels.dtype))
    assert jnp.allclose(prob1, ref_prob1, atol=1e-4, rtol=1e-4)

    # --- bf16 path (production default: bf16 operands, f32 accumulation). ---
    folded16, _ = fold_params(params, compute_dtype=jnp.bfloat16)
    fwd16 = jax.jit(functools.partial(concat_model_forward, num_labels=num_labels))
    pred16, prob1_16 = fwd16(tensors, emrs, kgs, folded16)
    jax.block_until_ready((pred16, prob1_16))

    assert pred16.shape == (B,) and prob1_16.shape == (B,)
    # bf16 operands: loosened tolerance; argmax may differ only on near-ties.
    assert jnp.allclose(prob1_16, ref_prob1, atol=5e-2, rtol=5e-2)

    print("KERNEL_OK")
</pallas_src>

<mosaic_0001>
module attributes {stable_mosaic.version = 11 : i64} {
  func.func @_concat_model_kernel(%arg0: i32, %arg1: memref<8x48xf32, #tpu.memory_space<vmem>>, %arg2: memref<56x128xf32, #tpu.memory_space<vmem>>, %arg3: memref<136x128xf32, #tpu.memory_space<vmem>>, %arg4: memref<8x1xi32, #tpu.memory_space<vmem>>, %arg5: memref<8x1xf32, #tpu.memory_space<vmem>>) attributes {dimension_semantics = [#tpu.dimension_semantics<parallel>], iteration_bounds = array<i64: 1>, scalar_prefetch = 0 : i64, scratch_operands = 0 : i64, tpu.core_type = #tpu.core_type<tc>, window_params = [{transform_indices = @transform_0, window_bounds = array<i64: 8, 48>}, {pipeline_mode = #tpu.pipeline_mode<synchronous>, transform_indices = @transform_1, window_bounds = array<i64: 56, 128>}, {pipeline_mode = #tpu.pipeline_mode<synchronous>, transform_indices = @transform_2, window_bounds = array<i64: 136, 128>}, {transform_indices = @transform_3, window_bounds = array<i64: 8, 1>}, {transform_indices = @transform_4, window_bounds = array<i64: 8, 1>}]} {
    %c0 = arith.constant 0 : index
    %c0_0 = arith.constant 0 : index
    %0 = vector.load %arg2[%c0, %c0_0] : memref<56x128xf32, #tpu.memory_space<vmem>>, vector<48x128xf32>
    %c48 = arith.constant 48 : index
    %c0_1 = arith.constant 0 : index
    %1 = vector.load %arg2[%c48, %c0_1] : memref<56x128xf32, #tpu.memory_space<vmem>>, vector<1x128xf32>
    %c0_2 = arith.constant 0 : index
    %c0_3 = arith.constant 0 : index
    %2 = vector.load %arg3[%c0_2, %c0_3] : memref<136x128xf32, #tpu.memory_space<vmem>>, vector<128x128xf32>
    %c128 = arith.constant 128 : index
    %c0_4 = arith.constant 0 : index
    %3 = vector.load %arg3[%c128, %c0_4] : memref<136x128xf32, #tpu.memory_space<vmem>>, vector<1x128xf32>
    %c0_5 = arith.constant 0 : index
    %c0_6 = arith.constant 0 : index
    %4 = vector.load %arg1[%c0_5, %c0_6] : memref<8x48xf32, #tpu.memory_space<vmem>>, vector<8x48xf32>
    %cst = arith.constant dense<0.000000e+00> : vector<8x128xf32>
    %5 = tpu.matmul %4, %0, %cst {dimension_numbers = #tpu.dot_dimension_numbers<[1], [0], [0], [1], [0, 0, 1, 1], [], []>} : vector<8x48xf32>, vector<48x128xf32>, vector<8x128xf32> -> vector<8x128xf32>
    %6 = vector.broadcast %1 : vector<1x128xf32> to vector<8x128xf32>
    %7 = arith.addf %5, %6 : vector<8x128xf32>
    %cst_7 = arith.constant 0.000000e+00 : f32
    %8 = vector.broadcast %cst_7 : f32 to vector<8x128xf32>
    %9 = arith.maximumf %7, %8 : vector<8x128xf32>
    %cst_8 = arith.constant dense<0.000000e+00> : vector<8x128xf32>
    %10 = tpu.matmul %9, %2, %cst_8 {dimension_numbers = #tpu.dot_dimension_numbers<[1], [0], [0], [1], [0, 0, 1, 1], [], []>} : vector<8x128xf32>, vector<128x128xf32>, vector<8x128xf32> -> vector<8x128xf32>
    %11 = vector.broadcast %3 : vector<1x128xf32> to vector<8x128xf32>
    %12 = arith.addf %10, %11 : vector<8x128xf32>
    %13 = tpu.iota {dimensions = array<i32: 1>} : vector<8x128xi32>
    %c4_i32 = arith.constant 4 : i32
    %14 = vector.broadcast %c4_i32 : i32 to vector<8x128xi32>
    %15 = arith.cmpi slt, %13, %14 : vector<8x128xi32>
    %cst_9 = arith.constant -3.000000e+38 : f32
    %16 = vector.broadcast %cst_9 : f32 to vector<8x128xf32>
    %17 = arith.select %15, %12, %16 : vector<8x128xi1>, vector<8x128xf32>
    %cst_10 = arith.constant dense<0xFF800000> : vector<8xf32>
    %18 = vector.multi_reduction <maximumf>, %17, %cst_10 [1] : vector<8x128xf32> to vector<8xf32>
    %19 = vector.shape_cast %18 : vector<8xf32> to vector<8x1xf32>
    %20 = vector.broadcast %19 : vector<8x1xf32> to vector<8x128xf32>
    %21 = arith.cmpf oeq, %17, %20 : vector<8x128xf32>
    %22 = arith.sitofp %13 : vector<8x128xi32> to vector<8x128xf32>
    %cst_11 = arith.constant 1.280000e+02 : f32
    %23 = vector.broadcast %cst_11 : f32 to vector<8x128xf32>
    %24 = arith.select %21, %22, %23 : vector<8x128xi1>, vector<8x128xf32>
    %cst_12 = arith.constant dense<0x7F800000> : vector<8xf32>
    %25 = vector.multi_reduction <minimumf>, %24, %cst_12 [1] : vector<8x128xf32> to vector<8xf32>
    %26 = vector.shape_cast %25 : vector<8xf32> to vector<8x1xf32>
    %27 = arith.fptosi %26 : vector<8x1xf32> to vector<8x1xi32>
    %c0_13 = arith.constant 0 : index
    %c0_14 = arith.constant 0 : index
    %28 = vector.load %arg4[%c0_13, %c0_14] : memref<8x1xi32, #tpu.memory_space<vmem>>, vector<8x1xi32>
    tpu.vector_store %arg4[%c0_13, %c0_14], %27 {strides = array<i32>} : memref<8x1xi32, #tpu.memory_space<vmem>>, vector<8x1xi32>,
    %29 = vector.extract_strided_slice %12 {offsets = [0, 1], sizes = [8, 1], strides = [1, 1]} : vector<8x128xf32> to vector<8x1xf32>
    %c0_15 = arith.constant 0 : index
    %c0_16 = arith.constant 0 : index
    %30 = vector.load %arg5[%c0_15, %c0_16] : memref<8x1xf32, #tpu.memory_space<vmem>>, vector<8x1xf32>
    tpu.vector_store %arg5[%c0_15, %c0_16], %29 {strides = array<i32>} : memref<8x1xf32, #tpu.memory_space<vmem>>, vector<8x1xf32>,
    return
  }
  func.func @transform_0(%arg0: i32) -> (i32, i32) {
    %c0_i32 = arith.constant 0 : i32
    %c0_i32_0 = arith.constant 0 : i32
    return %arg0, %c0_i32 : i32, i32
  }
  func.func @transform_1(%arg0: i32) -> (i32, i32) {
    %c0_i32 = arith.constant 0 : i32
    %c0_i32_0 = arith.constant 0 : i32
    %c0_i32_1 = arith.constant 0 : i32
    return %c0_i32, %c0_i32_0 : i32, i32
  }
  func.func @transform_2(%arg0: i32) -> (i32, i32) {
    %c0_i32 = arith.constant 0 : i32
    %c0_i32_0 = arith.constant 0 : i32
    %c0_i32_1 = arith.constant 0 : i32
    return %c0_i32, %c0_i32_0 : i32, i32
  }
  func.func @transform_3(%arg0: i32) -> (i32, i32) {
    %c0_i32 = arith.constant 0 : i32
    %c0_i32_0 = arith.constant 0 : i32
    return %arg0, %c0_i32 : i32, i32
  }
  func.func @transform_4(%arg0: i32) -> (i32, i32) {
    %c0_i32 = arith.constant 0 : i32
    %c0_i32_0 = arith.constant 0 : i32
    return %arg0, %c0_i32 : i32, i32
  }
}

</mosaic_0001>

<bundles_post_ra>
// kernel: concat_model_forward.1
= control target key start
LH: loop header
LB: loop body
LE: loop exit
PB: predicated region body
PF: predicated region fallthrough
CT: control target
= control target key end

     0   :  { %10 = vsyncpa [#allocation3], 0  ;;  %s452_s0 = inlined_call_operand.vmem [shape: f32[8,48], index: 0, kind: input, shape index: {}]   ;;  %s453_s1 = inlined_call_operand.hbm [shape: f32[56,128], index: 1, kind: input, shape index: {}]   ;;  %s454_s2 = inlined_call_operand.hbm [shape: f32[136,128], index: 2, kind: input, shape index: {}]   ;;  %s455_s3 = inlined_call_operand.vmem [shape: s32[8,1], index: 3, kind: output, shape index: {0}]   ;;  %s456_s4 = inlined_call_operand.vmem [shape: f32[8,1], index: 4, kind: output, shape index: {1}]  }
   0x1   :  { %11 = vsyncpa [#allocation5], 0  ;;  %s381_s15 = smov [#allocation2]  }
   0x2   :  { %s19_s16 = sshll.u32 %s381_s15, 4  ;;  %s20_s16 = int_to_ptr.vmem [resolvable:$true] %s19_s16 }
   0x3   :  { %s345_s17 = scalar_lea.vmem %s20_s16, 896  ;;  %p350_p1 = scmp.lt.s32.totalorder %s20_s16, %s20_s16 }
   0x4   :  { %p346_p0 = scmp.ne.s32.totalorder %s20_s16, %s345_s17  ;;  %p351_p2 = scmp.lt.s32.totalorder %s345_s17, %s345_s17 }
   0x6   :  { %p352_p3 = por %p351_p2, %p350_p1 }
   0x8   :  { %p353_p4 = pnand %p352_p3, %p346_p0 }
   0xa   :  { %356 = shalt.err (!%p353_p4)
}
   0xb   :  { %s382_s18 = smov 128   ;;  %s383_s19 = smov 8  }
   0xc   :  { %25 = dma.hbm_to_vmem [thread:$0]  %s453_s1, 896, %s20_s16, [#allocation3], %s382_s18, %s382_s18, %s383_s19  }
   0xd   :  { %s384_s22 = smov [#allocation4]  }
   0xe   :  { %s31_s23 = sshll.u32 %s384_s22, 4  ;;  %s32_s23 = int_to_ptr.vmem [resolvable:$true] %s31_s23 }
   0xf   :  { %s365_s24 = scalar_lea.vmem %s32_s23, 2176  ;;  %p370_p6 = scmp.lt.s32.totalorder %s32_s23, %s32_s23 }
  0x10   :  { %p366_p5 = scmp.ne.s32.totalorder %s32_s23, %s365_s24  ;;  %p371_p7 = scmp.lt.s32.totalorder %s365_s24, %s365_s24 }
  0x12   :  { %p372_p8 = por %p371_p7, %p370_p6 }
  0x14   :  { %p373_p9 = pnand %p372_p8, %p366_p5 }
  0x16   :  { %376 = shalt.err (!%p373_p9)
}
  0x17   :  { %37 = dma.hbm_to_vmem [thread:$0]  %s454_s2, 2176, %s32_s23, [#allocation5], %s382_s18, %s382_s18, %s383_s19  }
  0x18   :  { %377 = dma.done.wait [#allocation3], 896  }
  0x19   :  { %378 = vsyncadd [#allocation3], 4294966400 }
  0x1a   :  { %379 = dma.done.wait [#allocation5], 2176  }
  0x1b   :  { %380 = vsyncadd [#allocation5], 4294965120  ;;  %v385_v0 = vmov 0.0   ;;  %vm386_vm0 = vmmov 0   ;;  %v49_v1 = vld [vmem:[#allocation2 + $0x28] sm:$0xff]  ;;  %v48_v2 = vld [vmem:[#allocation2 + $0x20] sm:$0xff]  ;;  %v222_v29 = vlaneseq }
  0x1c   :  { %278 = vmatprep.subr.mxu0 %v385_v0  ;;  %290 = vmatprep.mubr.msk.f32.mxu0 %vm386_vm0, %v385_v0  ;;  %v47_v3 = vld [vmem:[#allocation2 + $0x18] sm:$0xff]  ;;  %v66_v4 = vld [vmem:[#allocation4 + $0x78] sm:$0xff]  ;;  %v65_v5 = vld [vmem:[#allocation4 + $0x70] sm:$0xff]  ;;  %vm73_vm1 = vcmask 392192   ;;  %vm234_vm3 = vcmask 7168  }
  0x1d   :  { %293 = vmatprep.subr.mxu1 %v385_v0  ;;  %325 = vmatprep.mubr.msk.f32.mxu1 %vm386_vm0, %v385_v0  ;;  %v46_v6 = vld [vmem:[#allocation2 + $0x10] sm:$0xff]  ;;  %v64_v7 = vld [vmem:[#allocation4 + $0x68] sm:$0xff]  ;;  %v45_v8 = vld [vmem:[#allocation2 + $0x8] sm:$0xff]  ;;  %v223_v30 = vand.u32 127, %v222_v29 }
  0x1e   :  { %279 = vmatpush3.msra.mxu0 %v49_v1  ;;  %294 = vmatpush3.msra.mxu1 %v66_v4  ;;  %v63_v9 = vld [vmem:[#allocation4 + $0x60] sm:$0xff]  ;;  %v44_v10 = vld [vmem:[#allocation2] sm:$0xff]  ;;  %v62_v11 = vld [vmem:[#allocation4 + $0x58] sm:$0xff] }
  0x1f   :  { %280 = vmatprep.subr.mxu0 %v385_v0  ;;  %295 = vmatprep.subr.mxu1 %v385_v0  ;;  %v68_v12 = vld [vmem:[%s452_s0] sm:$0xff]  ;;  %v61_v13 = vld [vmem:[#allocation4 + $0x50] sm:$0xff]  ;;  %v59_v15 = vld [vmem:[#allocation4 + $0x40] sm:$0xff]  ;;  %vm224_vm2 = vcmp.lt.s32.totalorder %v223_v30, 4  ;;  %s387_s0 = smov 127   ;;  %v229_v37 = vcvt.s32.f32 %v223_v30 }
  0x20   :  { %281 = vmatpush3.msra.mxu0 %v48_v2  ;;  %296 = vmatpush3.msra.mxu1 %v65_v5  ;;  %v60_v14 = vld [vmem:[#allocation4 + $0x48] sm:$0xff]  ;;  %v58_v16 = vld [vmem:[#allocation4 + $0x38] sm:$0xff]  ;;  %v57_v17 = vld [vmem:[#allocation4 + $0x30] sm:$0xff] }
  0x21   :  { %282 = vmatprep.subr.mxu0 %v385_v0  ;;  %297 = vmatprep.subr.mxu1 %v385_v0  ;;  %v56_v18 = vld [vmem:[#allocation4 + $0x28] sm:$0xff]  ;;  %v55_v19 = vld [vmem:[#allocation4 + $0x20] sm:$0xff]  ;;  %v54_v20 = vld [vmem:[#allocation4 + $0x18] sm:$0xff] }
  0x22   :  { %283 = vmatpush3.msra.mxu0 %v47_v3  ;;  %298 = vmatpush3.msra.mxu1 %v64_v7  ;;  %v53_v21 = vld [vmem:[#allocation4 + $0x10] sm:$0xff]  ;;  %v52_v22 = vld [vmem:[#allocation4 + $0x8] sm:$0xff]  ;;  %v51_v23 = vld [vmem:[#allocation4] sm:$0xff] }
  0x23   :  { %284 = vmatprep.subr.mxu0 %v385_v0  ;;  %299 = vmatprep.subr.mxu1 %v385_v0  ;;  %v251_v24 = vld [vmem:[#allocation2 + $0x30] ss:$0 sm:$0xff]  ;;  %v253_v31 = vld [vmem:[#allocation4 + $0x80] ss:$0 sm:$0xff] }
  0x24   :  { %285 = vmatpush3.msra.mxu0 %v46_v6  ;;  %300 = vmatpush3.msra.mxu1 %v63_v9 }
  0x25   :  { %286 = vmatprep.subr.mxu0 %v385_v0  ;;  %301 = vmatprep.subr.mxu1 %v385_v0 }
  0x26   :  { %287 = vmatpush3.msra.mxu0 %v45_v8  ;;  %302 = vmatpush3.msra.mxu1 %v62_v11 }
  0x27   :  { %288 = vmatprep.subr.mxu0 %v385_v0  ;;  %303 = vmatprep.subr.mxu1 %v385_v0 }
  0x28   :  { %289 = vmatpush3.msra.mxu0 %v44_v10  ;;  %304 = vmatpush3.msra.mxu1 %v61_v13 }
  0x29   :  { %291 = vmatmul.mubr.msk.f32.vlgmr.msra.gmra.mxu0 %vm73_vm1, %v68_v12  ;;  %305 = vmatprep.subr.mxu1 %v385_v0 }
  0x2a   :  { %306 = vmatpush3.msra.mxu1 %v60_v14 }
  0x2b   :  { %307 = vmatprep.subr.mxu1 %v385_v0 }
  0x2c   :  { %308 = vmatpush3.msra.mxu1 %v59_v15 }
  0x2d   :  { %309 = vmatprep.subr.mxu1 %v385_v0 }
  0x2e   :  { %310 = vmatpush3.msra.mxu1 %v58_v16 }
  0x2f   :  { %311 = vmatprep.subr.mxu1 %v385_v0 }
  0x30   :  { %312 = vmatpush3.msra.mxu1 %v57_v17 }
  0x31   :  { %313 = vmatprep.subr.mxu1 %v385_v0 }
  0x32   :  { %314 = vmatpush3.msra.mxu1 %v56_v18 }
  0x33   :  { %315 = vmatprep.subr.mxu1 %v385_v0 }
  0x34   :  { %316 = vmatpush3.msra.mxu1 %v55_v19 }
  0x35   :  { %317 = vmatprep.subr.mxu1 %v385_v0 }
  0x36   :  { %318 = vmatpush3.msra.mxu1 %v54_v20 }
  0x37   :  { %319 = vmatprep.subr.mxu1 %v385_v0 }
  0x38   :  { %320 = vmatpush3.msra.mxu1 %v53_v21 }
  0x39   :  { %321 = vmatprep.subr.mxu1 %v385_v0 }
  0x3a   :  { %322 = vmatpush3.msra.mxu1 %v52_v22 }
  0x3b   :  { %323 = vmatprep.subr.mxu1 %v385_v0 }
  0x3c   :  { %324 = vmatpush3.msra.mxu1 %v51_v23 }
  0xe9   :  { %v143_v25 = vpop.f32.mrf.mxu0 }
  0xea   :  { %v144_v26 = vadd.f32 %v251_v24, %v143_v25 }
  0xeb   :  { %v292_v27 = vpop.f32.mrf.mxu0 }
  0xec   :  { %v147_v28 = vmax.f32 %v144_v26, 0.0 }
  0xee   :  { %326 = vmatmul.mubr.f32.vlgmr.msra.gmra.mxu1 %v147_v28 }
 0x1ae   :  { %v218_v32 = vpop.f32.mrf.mxu1 }
 0x1af   :  { %v219_v33 = vadd.f32 %v253_v31, %v218_v32 }
 0x1b0   :  { %v327_v34 = vpop.f32.mrf.mxu1 }
 0x1b1   :  { %237 = vrot.lane.b32.xlu1 %v219_v33, %s387_s0  ;;  %v225_v35 = vsel %vm224_vm2, %v219_v33, -3e+38 }
 0x1b2   :  { %226 = vmax.xlane.f32.xlu0 %v225_v35 }
 0x223   :  { %v238_v36 = vpop.permute.xlu1 %237 }
 0x224   :  { %240 = vst.msk [vmem:[%s456_s4] sm:$0xff] %vm234_vm3, %v238_v36 }
 0x23b   :  { %v227_v38 = vpop.xlane.xlu0 %226 }
 0x23c   :  { %vm228_vm4 = vcmp.eq.f32.partialorder %v225_v35, %v227_v38 }
 0x23d   :  { %v230_v39 = vsel %vm228_vm4, %v229_v37, 128.0 }
 0x23e   :  { %231 = vmin.xlane.f32.xlu0 %v230_v39 }
 0x2c7   :  { %v232_v40 = vpop.xlane.xlu0 %231 }
 0x2c8   :  { %v328_v41 = vtrunc.f32 %v232_v40 }
 0x2ca   :  { %v329_v42 = vcvt.f32.s32 %v328_v41 }
 0x2cc   :  { %235 = vst.msk [vmem:[%s455_s3] sm:$0xff] %vm234_vm3, %v329_v42 }
 0x2cd   :  { %249 = vsyncpa [#allocation3], 1 }
 0x2ce   :  { %250 = vsyncpa [#allocation5], 1 }

</bundles_post_ra>
